<compile_context>
chip_gen: v6e
topology: v6e:2x2x1
jax: 0.10.0
libtpu: 0.0.40
codegen_flags: <defaults>
</compile_context>

<pallas_src>
import functools

import jax
import jax.numpy as jnp
from jax import lax
from jax.experimental import pallas as pl
from jax.experimental.pallas import tpu as pltpu


def _round_up(x, m):
    return ((x + m - 1) // m) * m


def _feature_fusion_kernel(x1_ref, x2_ref, w1_ref, w2_ref, bias_ref,
                           wse1_ref, wse2_ref, o_ref, psum_ref, se_ref,
                           *maybe_fm, inv_hw, block_hw, hw_valid, hw_pad,
                           use_fm_scratch):
    # Grid: (N, 2, T) -- batch (parallel), pass (arbitrary), HW tile (arbitrary)
    #   pass 0: fm tile -> [fm scratch], accumulate spatial sum into psum_ref
    #   pass 1: (t == 0) compute (1 + se); every t: write fm * (1 + se)
    fm_ref = maybe_fm[0] if use_fm_scratch else None
    p = pl.program_id(1)
    t = pl.program_id(2)

    def compute_fm():
        # 1x1 conv over the concatenated channels == sum of two partial matmuls.
        # BN scale is already folded into w1/w2; only bias + ReLU remain.
        fm = jnp.dot(w1_ref[...], x1_ref[0], preferred_element_type=jnp.float32)
        fm = fm + jnp.dot(w2_ref[...], x2_ref[0], preferred_element_type=jnp.float32)
        fm = fm + bias_ref[...]
        return jnp.maximum(fm, 0.0)                       # (Cout, block_hw)

    @pl.when((p == 0) & (t == 0))
    def _():
        psum_ref[...] = jnp.zeros_like(psum_ref)

    @pl.when(p == 0)
    def _():
        fm = compute_fm()
        if hw_pad != hw_valid:
            # Mask zero-padded lanes out of the pooled sum (mean must match the
            # un-padded image).
            col = lax.broadcasted_iota(jnp.int32, fm.shape, 1)
            valid = hw_valid - t * block_hw
            fm_for_sum = jnp.where(col < valid, fm, 0.0)
        else:
            fm_for_sum = fm
        psum_ref[...] += jnp.sum(fm_for_sum, axis=1, keepdims=True)
        if use_fm_scratch:
            start = pl.multiple_of(t * block_hw, block_hw)
            fm_ref[:, pl.ds(start, block_hw)] = fm
        # Keep valid data in the resident output buffer so no flush of an
        # uninitialized block can ever happen (robust against revisit-policy
        # changes); under the documented policy this is only a VMEM store.
        o_ref[0] = fm.astype(o_ref.dtype)

    @pl.when((p == 1) & (t == 0))
    def _():
        pooled = psum_ref[...] * inv_hw                   # (Cout, 1) spatial mean
        h = jnp.maximum(
            jnp.dot(wse1_ref[...], pooled, preferred_element_type=jnp.float32),
            0.0)                                          # (Cmid, 1)
        se = jax.nn.sigmoid(
            jnp.dot(wse2_ref[...], h, preferred_element_type=jnp.float32))
        se_ref[...] = 1.0 + se                            # (Cout, 1)

    @pl.when(p == 1)
    def _():
        if use_fm_scratch:
            start = pl.multiple_of(t * block_hw, block_hw)
            fm = fm_ref[:, pl.ds(start, block_hw)]
        else:
            fm = compute_fm()
        # output = fm + fm * se == fm * (1 + se), broadcast over lanes (HW)
        o_ref[0] = (fm * se_ref[...]).astype(o_ref.dtype)


def feature_fusion(x1_nchw, x2_nchw, params, *, block_hw=None,
                   use_fm_scratch=None, io_dtype=jnp.float32):
    """x1, x2: NCHW arrays. Returns NCHW float32 output (matches PyTorch)."""
    N, C1, H, W = x1_nchw.shape
    C2 = x2_nchw.shape[1]
    HW = H * W

    # PyTorch-layout weights: w_conv (Cout, Cin), w_se1 (Cmid, Cout), w_se2 (Cout, Cmid)
    w = params["w_conv"].astype(jnp.float32)
    Cout = w.shape[0]

    # Fold BN (eval mode) into the conv weight (scale) and a per-channel bias.
    scale = (params["bn_gamma"] / jnp.sqrt(params["bn_var"] + params["bn_eps"])
             ).astype(jnp.float32)
    bias = (params["bn_beta"] - params["bn_mean"] * scale).astype(jnp.float32)
    w1s = (w[:, :C1] * scale[:, None]).astype(jnp.float32)   # (Cout, C1)
    w2s = (w[:, C1:] * scale[:, None]).astype(jnp.float32)   # (Cout, C2)
    bias = bias.reshape(Cout, 1)

    wse1 = params["w_se1"].astype(jnp.float32)                # (Cmid, Cout)
    wse2 = params["w_se2"].astype(jnp.float32)                # (Cout, Cmid)
    Cmid = wse1.shape[0]

    # ---- Generation-aware VMEM budgets --------------------------------------
    try:
        vmem_cap = int(pltpu.get_tpu_info().vmem_capacity_bytes)
    except Exception:
        vmem_cap = 64 * 1024 * 1024          # conservative (v7x-class)
    usable = (vmem_cap * 5) // 8             # headroom for Mosaic internal scratch
    fm_budget = vmem_cap // 4                # ~16 MiB on 64 MiB, ~32 MiB on 128 MiB

    in_bytes = jnp.dtype(io_dtype).itemsize
    hw128 = _round_up(HW, 128)

    if use_fm_scratch is None:
        use_fm_scratch = (4 * Cout * hw128) <= fm_budget

    if block_hw is None:
        # Double-buffered x1+x2 (io dtype) and output (f32) per HW column.
        per_col = 2 * (in_bytes * (C1 + C2) + 4 * Cout)
        budget = usable - (4 * Cout * hw128 if use_fm_scratch else 0)
        cap = max(budget // per_col, 128)
        hard_cap = 16384 if vmem_cap <= 72 * 1024 * 1024 else 32768
        block_hw = min((int(cap) // 128) * 128, hard_cap, hw128)
        block_hw = max(block_hw, 128)
    assert block_hw % 128 == 0, "block_hw must be a multiple of 128"

    T = (HW + block_hw - 1) // block_hw
    HW_pad = T * block_hw
    # Re-validate the fm scratch against the actual padded size.
    if use_fm_scratch and 4 * Cout * HW_pad > fm_budget:
        use_fm_scratch = False

    # Free reshapes (no transpose, no concat): NCHW -> [N, C, HW]; pad HW so
    # every tile stays lane-dense and pipelined.
    x1 = x1_nchw.reshape(N, C1, HW).astype(io_dtype)
    x2 = x2_nchw.reshape(N, C2, HW).astype(io_dtype)
    if HW_pad != HW:
        pad = HW_pad - HW
        x1 = jnp.pad(x1, ((0, 0), (0, 0), (0, pad)))
        x2 = jnp.pad(x2, ((0, 0), (0, 0), (0, pad)))

    if use_fm_scratch:
        # x1/x2 are only needed in pass 0; pin their block index during pass 1
        # so no redundant HBM re-read is issued.
        x_map = lambda n, p, t: (n, 0, t * (1 - p) + (T - 1) * p)
    else:
        x_map = lambda n, p, t: (n, 0, t)

    kernel = functools.partial(
        _feature_fusion_kernel, inv_hw=1.0 / HW, block_hw=block_hw,
        hw_valid=HW, hw_pad=HW_pad, use_fm_scratch=use_fm_scratch)

    scratch_shapes = [
        pltpu.VMEM((Cout, 1), jnp.float32),   # pooled-sum accumulator
        pltpu.VMEM((Cout, 1), jnp.float32),   # (1 + se) scale
    ]
    if use_fm_scratch:
        scratch_shapes.append(pltpu.VMEM((Cout, HW_pad), jnp.float32))

    flops = 2 * N * Cout * (C1 + C2) * HW_pad * (1 if use_fm_scratch else 2)
    bytes_accessed = (N * (C1 + C2) * HW_pad * in_bytes *
                      (1 if use_fm_scratch else 2)
                      + N * Cout * HW_pad * 4
                      + 4 * (w1s.size + w2s.size + bias.size + wse1.size + wse2.size))

    out = pl.pallas_call(
        kernel,
        out_shape=jax.ShapeDtypeStruct((N, Cout, HW_pad), jnp.float32),
        grid_spec=pltpu.PrefetchScalarGridSpec(
            num_scalar_prefetch=0,
            grid=(N, 2, T),
            in_specs=[
                pl.BlockSpec((1, C1, block_hw), x_map),
                pl.BlockSpec((1, C2, block_hw), x_map),
                pl.BlockSpec((Cout, C1), lambda n, p, t: (0, 0)),
                pl.BlockSpec((Cout, C2), lambda n, p, t: (0, 0)),
                pl.BlockSpec((Cout, 1), lambda n, p, t: (0, 0)),
                pl.BlockSpec((Cmid, Cout), lambda n, p, t: (0, 0)),
                pl.BlockSpec((Cout, Cmid), lambda n, p, t: (0, 0)),
            ],
            # Pass 0 keeps the output block index at (n,0,0) (no flush until the
            # index changes in pass 1); the buffer also always holds valid data.
            out_specs=pl.BlockSpec((1, Cout, block_hw),
                                   lambda n, p, t: (n, 0, t * p)),
            scratch_shapes=scratch_shapes,
        ),
        compiler_params=pltpu.CompilerParams(
            dimension_semantics=("parallel", "arbitrary", "arbitrary"),
            vmem_limit_bytes=int(usable),
        ),
        cost_estimate=pl.CostEstimate(
            flops=int(flops),
            transcendentals=int(N * Cout),
            bytes_accessed=int(bytes_accessed)),
    )(x1, x2, w1s, w2s, bias, wse1, wse2)

    if HW_pad != HW:
        out = out[:, :, :HW]
    return out.reshape(N, Cout, H, W)


def _reference(x1, x2, params):
    """Pure-JAX reference with identical semantics (for sanity check)."""
    x = jnp.concatenate([x1, x2], axis=1)                  # (N, Cin, H, W)
    w = params["w_conv"]                                   # (Cout, Cin)
    fm = jnp.einsum("oc,nchw->nohw", w, x)
    scale = params["bn_gamma"] / jnp.sqrt(params["bn_var"] + params["bn_eps"])
    bias = params["bn_beta"] - params["bn_mean"] * scale
    fm = jnp.maximum(fm * scale[None, :, None, None] + bias[None, :, None, None], 0.0)
    pooled = jnp.mean(fm, axis=(2, 3))                     # (N, Cout)
    h = jnp.maximum(pooled @ params["w_se1"].T, 0.0)       # (N, Cmid)
    se = jax.nn.sigmoid(h @ params["w_se2"].T)             # (N, Cout)
    return fm * (1.0 + se)[:, :, None, None]


if __name__ == "__main__":
    # FeatureFusion(in_planes=8, out_planes=8, reduction=1)
    # x1, x2: (N=2, C=4, H=16, W=16) so concat channels == in_planes == 8.
    key = jax.random.PRNGKey(0)
    k1, k2, k3, k4, k5, k6, k7, k8, k9 = jax.random.split(key, 9)

    N, C_half, H, W = 2, 4, 16, 16
    in_planes = 2 * C_half
    out_planes = 8
    reduction = 1
    mid = out_planes // reduction

    x1 = jax.random.normal(k1, (N, C_half, H, W), dtype=jnp.float32)
    x2 = jax.random.normal(k2, (N, C_half, H, W), dtype=jnp.float32)

    params = {
        # Conv2d(in_planes, out_planes, 1, bias=False) weight, PyTorch layout (Cout, Cin)
        "w_conv": 0.1 * jax.random.normal(k3, (out_planes, in_planes), dtype=jnp.float32),
        "bn_gamma": 1.0 + 0.1 * jax.random.normal(k4, (out_planes,), dtype=jnp.float32),
        "bn_beta": 0.1 * jax.random.normal(k5, (out_planes,), dtype=jnp.float32),
        "bn_mean": 0.1 * jax.random.normal(k6, (out_planes,), dtype=jnp.float32),
        "bn_var": jnp.abs(1.0 + 0.1 * jax.random.normal(k7, (out_planes,), dtype=jnp.float32)),
        "bn_eps": jnp.float32(1e-5),
        # SE 1x1 convs (no bias), PyTorch layout (out, in)
        "w_se1": 0.1 * jax.random.normal(k8, (mid, out_planes), dtype=jnp.float32),
        "w_se2": 0.1 * jax.random.normal(k9, (out_planes, mid), dtype=jnp.float32),
    }

    ref = _reference(x1, x2, params)

    # Default path: VMEM-derived tile size + fm cached in VMEM scratch.
    out_a = jax.block_until_ready(feature_fusion(x1, x2, params))
    # Multi-tile recompute-fallback path (fm scratch disabled).
    out_b = jax.block_until_ready(
        feature_fusion(x1, x2, params, block_hw=128, use_fm_scratch=False))

    assert out_a.shape == (N, out_planes, H, W)
    assert jnp.allclose(out_a, ref, atol=1e-4, rtol=1e-4), float(jnp.max(jnp.abs(out_a - ref)))
    assert jnp.allclose(out_b, ref, atol=1e-4, rtol=1e-4), float(jnp.max(jnp.abs(out_b - ref)))

    # Unaligned-HW path (padding + masked pooled-sum): 15x15 image, 2 HW tiles.
    x1u, x2u = x1[:, :, :15, :15], x2[:, :, :15, :15]
    refu = _reference(x1u, x2u, params)
    out_u = jax.block_until_ready(feature_fusion(x1u, x2u, params, block_hw=128))
    assert jnp.allclose(out_u, refu, atol=1e-4, rtol=1e-4), float(jnp.max(jnp.abs(out_u - refu)))

    print("KERNEL_OK")
</pallas_src>

<mosaic_0001>
module attributes {stable_mosaic.version = 11 : i64} {
  func.func @_feature_fusion_kernel(%arg0: i32, %arg1: i32, %arg2: i32, %arg3: memref<1x4x256xf32, #tpu.memory_space<vmem>>, %arg4: memref<1x4x256xf32, #tpu.memory_space<vmem>>, %arg5: memref<8x4xf32, #tpu.memory_space<vmem>>, %arg6: memref<8x4xf32, #tpu.memory_space<vmem>>, %arg7: memref<8x1xf32, #tpu.memory_space<vmem>>, %arg8: memref<8x8xf32, #tpu.memory_space<vmem>>, %arg9: memref<8x8xf32, #tpu.memory_space<vmem>>, %arg10: memref<1x8x256xf32, #tpu.memory_space<vmem>>, %arg11: memref<8x1xf32, #tpu.memory_space<vmem>>, %arg12: memref<8x1xf32, #tpu.memory_space<vmem>>, %arg13: memref<8x256xf32, #tpu.memory_space<vmem>>) attributes {dimension_semantics = [#tpu.dimension_semantics<parallel>, #tpu.dimension_semantics<arbitrary>, #tpu.dimension_semantics<arbitrary>], iteration_bounds = array<i64: 2, 2, 1>, scalar_prefetch = 0 : i64, scratch_operands = 3 : i64, tpu.core_type = #tpu.core_type<tc>, window_params = [{transform_indices = @transform_0, window_bounds = array<i64: 1, 4, 256>}, {transform_indices = @transform_1, window_bounds = array<i64: 1, 4, 256>}, {pipeline_mode = #tpu.pipeline_mode<synchronous>, transform_indices = @transform_2, window_bounds = array<i64: 8, 4>}, {pipeline_mode = #tpu.pipeline_mode<synchronous>, transform_indices = @transform_3, window_bounds = array<i64: 8, 4>}, {pipeline_mode = #tpu.pipeline_mode<synchronous>, transform_indices = @transform_4, window_bounds = array<i64: 8, 1>}, {pipeline_mode = #tpu.pipeline_mode<synchronous>, transform_indices = @transform_5, window_bounds = array<i64: 8, 8>}, {pipeline_mode = #tpu.pipeline_mode<synchronous>, transform_indices = @transform_6, window_bounds = array<i64: 8, 8>}, {transform_indices = @transform_7, window_bounds = array<i64: 1, 8, 256>}]} {
    %c0_i32 = arith.constant 0 : i32
    %0 = arith.cmpi eq, %arg1, %c0_i32 : i32
    %c0_i32_0 = arith.constant 0 : i32
    %1 = arith.cmpi eq, %arg2, %c0_i32_0 : i32
    %2 = arith.andi %0, %1 : i1
    %3 = arith.extui %2 : i1 to i32
    %c0_i32_1 = arith.constant 0 : i32
    %4 = arith.cmpi ne, %3, %c0_i32_1 : i32
    scf.if %4 {
      %cst = arith.constant 0.000000e+00 : f32
      %16 = vector.broadcast %cst : f32 to vector<8x1xf32>
      %c0 = arith.constant 0 : index
      %c0_8 = arith.constant 0 : index
      %17 = vector.load %arg11[%c0, %c0_8] : memref<8x1xf32, #tpu.memory_space<vmem>>, vector<8x1xf32>
      tpu.vector_store %arg11[%c0, %c0_8], %16 {strides = array<i32>} : memref<8x1xf32, #tpu.memory_space<vmem>>, vector<8x1xf32>,
    } else {
    }
    %c0_i32_2 = arith.constant 0 : i32
    %5 = arith.cmpi eq, %arg1, %c0_i32_2 : i32
    %6 = arith.extui %5 : i1 to i32
    %c0_i32_3 = arith.constant 0 : i32
    %7 = arith.cmpi ne, %6, %c0_i32_3 : i32
    scf.if %7 {
      %c0 = arith.constant 0 : index
      %c0_8 = arith.constant 0 : index
      %16 = vector.load %arg5[%c0, %c0_8] : memref<8x4xf32, #tpu.memory_space<vmem>>, vector<8x4xf32>
      %c0_9 = arith.constant 0 : index
      %c0_10 = arith.constant 0 : index
      %c0_11 = arith.constant 0 : index
      %17 = vector.load %arg3[%c0_9, %c0_10, %c0_11] : memref<1x4x256xf32, #tpu.memory_space<vmem>>, vector<1x4x256xf32>
      %18 = vector.shape_cast %17 : vector<1x4x256xf32> to vector<4x256xf32>
      %cst = arith.constant dense<0.000000e+00> : vector<8x256xf32>
      %19 = tpu.matmul %16, %18, %cst {dimension_numbers = #tpu.dot_dimension_numbers<[1], [0], [0], [1], [0, 0, 1, 1], [], []>} : vector<8x4xf32>, vector<4x256xf32>, vector<8x256xf32> -> vector<8x256xf32>
      %c0_12 = arith.constant 0 : index
      %c0_13 = arith.constant 0 : index
      %20 = vector.load %arg6[%c0_12, %c0_13] : memref<8x4xf32, #tpu.memory_space<vmem>>, vector<8x4xf32>
      %c0_14 = arith.constant 0 : index
      %c0_15 = arith.constant 0 : index
      %c0_16 = arith.constant 0 : index
      %21 = vector.load %arg4[%c0_14, %c0_15, %c0_16] : memref<1x4x256xf32, #tpu.memory_space<vmem>>, vector<1x4x256xf32>
      %22 = vector.shape_cast %21 : vector<1x4x256xf32> to vector<4x256xf32>
      %cst_17 = arith.constant dense<0.000000e+00> : vector<8x256xf32>
      %23 = tpu.matmul %20, %22, %cst_17 {dimension_numbers = #tpu.dot_dimension_numbers<[1], [0], [0], [1], [0, 0, 1, 1], [], []>} : vector<8x4xf32>, vector<4x256xf32>, vector<8x256xf32> -> vector<8x256xf32>
      %24 = arith.addf %19, %23 : vector<8x256xf32>
      %c0_18 = arith.constant 0 : index
      %c0_19 = arith.constant 0 : index
      %25 = vector.load %arg7[%c0_18, %c0_19] : memref<8x1xf32, #tpu.memory_space<vmem>>, vector<8x1xf32>
      %26 = vector.broadcast %25 : vector<8x1xf32> to vector<8x256xf32>
      %27 = arith.addf %24, %26 : vector<8x256xf32>
      %cst_20 = arith.constant 0.000000e+00 : f32
      %28 = vector.broadcast %cst_20 : f32 to vector<8x256xf32>
      %29 = arith.maximumf %27, %28 : vector<8x256xf32>
      %c0_21 = arith.constant 0 : index
      %c0_22 = arith.constant 0 : index
      %30 = vector.load %arg11[%c0_21, %c0_22] : memref<8x1xf32, #tpu.memory_space<vmem>>, vector<8x1xf32>
      %cst_23 = arith.constant dense<0.000000e+00> : vector<8xf32>
      %31 = vector.multi_reduction <add>, %29, %cst_23 [1] : vector<8x256xf32> to vector<8xf32>
      %32 = vector.shape_cast %31 : vector<8xf32> to vector<8x1xf32>
      %33 = arith.addf %30, %32 : vector<8x1xf32>
      %c0_24 = arith.constant 0 : index
      %c0_25 = arith.constant 0 : index
      %34 = vector.load %arg11[%c0_24, %c0_25] : memref<8x1xf32, #tpu.memory_space<vmem>>, vector<8x1xf32>
      tpu.vector_store %arg11[%c0_24, %c0_25], %33 {strides = array<i32>} : memref<8x1xf32, #tpu.memory_space<vmem>>, vector<8x1xf32>,
      %c256_i32 = arith.constant 256 : i32
      %35 = arith.muli %arg2, %c256_i32 : i32
      %36 = tpu.assume_multiple %35, 256 : i32
      %c0_26 = arith.constant 0 : index
      %37 = arith.index_cast %36 : i32 to index
      %38 = vector.load %arg13[%c0_26, %37] : memref<8x256xf32, #tpu.memory_space<vmem>>, vector<8x256xf32>
      tpu.vector_store %arg13[%c0_26, %37], %29 {strides = array<i32>} : memref<8x256xf32, #tpu.memory_space<vmem>>, vector<8x256xf32>,
      %c0_27 = arith.constant 0 : index
      %c0_28 = arith.constant 0 : index
      %c0_29 = arith.constant 0 : index
      %39 = vector.load %arg10[%c0_27, %c0_28, %c0_29] : memref<1x8x256xf32, #tpu.memory_space<vmem>>, vector<1x8x256xf32>
      %40 = vector.shape_cast %39 : vector<1x8x256xf32> to vector<8x256xf32>
      %41 = vector.shape_cast %29 : vector<8x256xf32> to vector<1x8x256xf32>
      tpu.vector_store %arg10[%c0_27, %c0_28, %c0_29], %41 {strides = array<i32>} : memref<1x8x256xf32, #tpu.memory_space<vmem>>, vector<1x8x256xf32>,
    } else {
    }
    %c1_i32 = arith.constant 1 : i32
    %8 = arith.cmpi eq, %arg1, %c1_i32 : i32
    %c0_i32_4 = arith.constant 0 : i32
    %9 = arith.cmpi eq, %arg2, %c0_i32_4 : i32
    %10 = arith.andi %8, %9 : i1
    %11 = arith.extui %10 : i1 to i32
    %c0_i32_5 = arith.constant 0 : i32
    %12 = arith.cmpi ne, %11, %c0_i32_5 : i32
    scf.if %12 {
      %c0 = arith.constant 0 : index
      %c0_8 = arith.constant 0 : index
      %16 = vector.load %arg11[%c0, %c0_8] : memref<8x1xf32, #tpu.memory_space<vmem>>, vector<8x1xf32>
      %cst = arith.constant 3.906250e-03 : f32
      %17 = vector.broadcast %cst : f32 to vector<8x1xf32>
      %18 = arith.mulf %16, %17 : vector<8x1xf32>
      %c0_9 = arith.constant 0 : index
      %c0_10 = arith.constant 0 : index
      %19 = vector.load %arg8[%c0_9, %c0_10] : memref<8x8xf32, #tpu.memory_space<vmem>>, vector<8x8xf32>
      %cst_11 = arith.constant dense<0.000000e+00> : vector<8x1xf32>
      %20 = tpu.matmul %19, %18, %cst_11 {dimension_numbers = #tpu.dot_dimension_numbers<[1], [0], [0], [1], [0, 0, 1, 1], [], []>} : vector<8x8xf32>, vector<8x1xf32>, vector<8x1xf32> -> vector<8x1xf32>
      %cst_12 = arith.constant 0.000000e+00 : f32
      %21 = vector.broadcast %cst_12 : f32 to vector<8x1xf32>
      %22 = arith.maximumf %20, %21 : vector<8x1xf32>
      %c0_13 = arith.constant 0 : index
      %c0_14 = arith.constant 0 : index
      %23 = vector.load %arg9[%c0_13, %c0_14] : memref<8x8xf32, #tpu.memory_space<vmem>>, vector<8x8xf32>
      %cst_15 = arith.constant dense<0.000000e+00> : vector<8x1xf32>
      %24 = tpu.matmul %23, %22, %cst_15 {dimension_numbers = #tpu.dot_dimension_numbers<[1], [0], [0], [1], [0, 0, 1, 1], [], []>} : vector<8x8xf32>, vector<8x1xf32>, vector<8x1xf32> -> vector<8x1xf32>
      %25 = arith.negf %24 : vector<8x1xf32>
      %26 = math.exp %25 : vector<8x1xf32>
      %cst_16 = arith.constant 1.000000e+00 : f32
      %27 = vector.broadcast %cst_16 : f32 to vector<8x1xf32>
      %28 = arith.addf %27, %26 : vector<8x1xf32>
      %29 = arith.divf %27, %28 : vector<8x1xf32>
      %cst_17 = arith.constant 1.000000e+00 : f32
      %30 = vector.broadcast %cst_17 : f32 to vector<8x1xf32>
      %31 = arith.addf %30, %29 : vector<8x1xf32>
      %c0_18 = arith.constant 0 : index
      %c0_19 = arith.constant 0 : index
      %32 = vector.load %arg12[%c0_18, %c0_19] : memref<8x1xf32, #tpu.memory_space<vmem>>, vector<8x1xf32>
      tpu.vector_store %arg12[%c0_18, %c0_19], %31 {strides = array<i32>} : memref<8x1xf32, #tpu.memory_space<vmem>>, vector<8x1xf32>,
    } else {
    }
    %c1_i32_6 = arith.constant 1 : i32
    %13 = arith.cmpi eq, %arg1, %c1_i32_6 : i32
    %14 = arith.extui %13 : i1 to i32
    %c0_i32_7 = arith.constant 0 : i32
    %15 = arith.cmpi ne, %14, %c0_i32_7 : i32
    scf.if %15 {
      %c256_i32 = arith.constant 256 : i32
      %16 = arith.muli %arg2, %c256_i32 : i32
      %17 = tpu.assume_multiple %16, 256 : i32
      %c0 = arith.constant 0 : index
      %18 = arith.index_cast %17 : i32 to index
      %19 = vector.load %arg13[%c0, %18] : memref<8x256xf32, #tpu.memory_space<vmem>>, vector<8x256xf32>
      %c0_8 = arith.constant 0 : index
      %c0_9 = arith.constant 0 : index
      %20 = vector.load %arg12[%c0_8, %c0_9] : memref<8x1xf32, #tpu.memory_space<vmem>>, vector<8x1xf32>
      %21 = vector.broadcast %20 : vector<8x1xf32> to vector<8x256xf32>
      %22 = arith.mulf %19, %21 : vector<8x256xf32>
      %c0_10 = arith.constant 0 : index
      %c0_11 = arith.constant 0 : index
      %c0_12 = arith.constant 0 : index
      %23 = vector.load %arg10[%c0_10, %c0_11, %c0_12] : memref<1x8x256xf32, #tpu.memory_space<vmem>>, vector<1x8x256xf32>
      %24 = vector.shape_cast %23 : vector<1x8x256xf32> to vector<8x256xf32>
      %25 = vector.shape_cast %22 : vector<8x256xf32> to vector<1x8x256xf32>
      tpu.vector_store %arg10[%c0_10, %c0_11, %c0_12], %25 {strides = array<i32>} : memref<1x8x256xf32, #tpu.memory_space<vmem>>, vector<1x8x256xf32>,
    } else {
    }
    return
  }
  func.func @transform_0(%arg0: i32, %arg1: i32, %arg2: i32) -> (i32, i32, i32) {
    %c1_i32 = arith.constant 1 : i32
    %0 = arith.subi %c1_i32, %arg1 : i32
    %1 = arith.muli %arg2, %0 : i32
    %c0_i32 = arith.constant 0 : i32
    %2 = arith.muli %c0_i32, %arg1 : i32
    %3 = arith.addi %1, %2 : i32
    %c0_i32_0 = arith.constant 0 : i32
    %c0_i32_1 = arith.constant 0 : i32
    return %arg0, %c0_i32_0, %3 : i32, i32, i32
  }
  func.func @transform_1(%arg0: i32, %arg1: i32, %arg2: i32) -> (i32, i32, i32) {
    %c1_i32 = arith.constant 1 : i32
    %0 = arith.subi %c1_i32, %arg1 : i32
    %1 = arith.muli %arg2, %0 : i32
    %c0_i32 = arith.constant 0 : i32
    %2 = arith.muli %c0_i32, %arg1 : i32
    %3 = arith.addi %1, %2 : i32
    %c0_i32_0 = arith.constant 0 : i32
    %c0_i32_1 = arith.constant 0 : i32
    return %arg0, %c0_i32_0, %3 : i32, i32, i32
  }
  func.func @transform_2(%arg0: i32, %arg1: i32, %arg2: i32) -> (i32, i32) {
    %c0_i32 = arith.constant 0 : i32
    %c0_i32_0 = arith.constant 0 : i32
    %c0_i32_1 = arith.constant 0 : i32
    return %c0_i32, %c0_i32_0 : i32, i32
  }
  func.func @transform_3(%arg0: i32, %arg1: i32, %arg2: i32) -> (i32, i32) {
    %c0_i32 = arith.constant 0 : i32
    %c0_i32_0 = arith.constant 0 : i32
    %c0_i32_1 = arith.constant 0 : i32
    return %c0_i32, %c0_i32_0 : i32, i32
  }
  func.func @transform_4(%arg0: i32, %arg1: i32, %arg2: i32) -> (i32, i32) {
    %c0_i32 = arith.constant 0 : i32
    %c0_i32_0 = arith.constant 0 : i32
    %c0_i32_1 = arith.constant 0 : i32
    return %c0_i32, %c0_i32_0 : i32, i32
  }
  func.func @transform_5(%arg0: i32, %arg1: i32, %arg2: i32) -> (i32, i32) {
    %c0_i32 = arith.constant 0 : i32
    %c0_i32_0 = arith.constant 0 : i32
    %c0_i32_1 = arith.constant 0 : i32
    return %c0_i32, %c0_i32_0 : i32, i32
  }
  func.func @transform_6(%arg0: i32, %arg1: i32, %arg2: i32) -> (i32, i32) {
    %c0_i32 = arith.constant 0 : i32
    %c0_i32_0 = arith.constant 0 : i32
    %c0_i32_1 = arith.constant 0 : i32
    return %c0_i32, %c0_i32_0 : i32, i32
  }
  func.func @transform_7(%arg0: i32, %arg1: i32, %arg2: i32) -> (i32, i32, i32) {
    %0 = arith.muli %arg2, %arg1 : i32
    %c0_i32 = arith.constant 0 : i32
    %c0_i32_0 = arith.constant 0 : i32
    return %arg0, %c0_i32, %0 : i32, i32, i32
  }
}

</mosaic_0001>

<bundles_post_ra>
// kernel: tpu_custom_call.1
= control target key start
LH: loop header
LB: loop body
LE: loop exit
PB: predicated region body
PF: predicated region fallthrough
CT: control target
= control target key end

     0   :  { %s1409_s0 = inlined_call_operand.vmem [shape: f32[2,4,256], index: 0, kind: input, shape index: {}]   ;;  %s1410_s1 = inlined_call_operand.vmem [shape: f32[2,4,256], index: 1, kind: input, shape index: {}]   ;;  %s1411_s2 = inlined_call_operand.vmem [shape: f32[8,4], index: 2, kind: input, shape index: {}]   ;;  %s1412_s3 = inlined_call_operand.vmem [shape: f32[8,4], index: 3, kind: input, shape index: {}]   ;;  %s1413_s4 = inlined_call_operand.vmem [shape: f32[8,1], index: 4, kind: input, shape index: {}]   ;;  %s1414_s5 = inlined_call_operand.vmem [shape: f32[8,8], index: 5, kind: input, shape index: {}]   ;;  %s1415_s6 = inlined_call_operand.hbm [shape: f32[8,8], index: 6, kind: input, shape index: {}]   ;;  %s1416_s7 = inlined_call_operand.hbm [shape: f32[2,8,256], index: 7, kind: output, shape index: {}]  }
   0x1   :  { %1417 = sst [smem:[#allocation11_spill]] %s1415_s6 }
   0x2   :  { %12 = vsyncpa [#allocation6], 0 }
   0x3   :  { %13 = vsyncpa [#allocation7], 0 }
   0x4   :  { %15 = vsyncpa [#allocation7 + $0x1], 0  ;;  %s1235_s24 = smov 0   ;;  %s1237_s25 = smov 0  }
   0x5   :  { %s1239_s26 = smov 0   ;;  %s1241_s27 = smov 0  }
   0x6   :  { %s1243_s28 = smov 0   ;;  %s1245_s29 = smov 0  }
   0x7   :  { %s1247_s30 = smov 0   ;;  %s1249_s8 = smov 0  }
   0x8 LB: > { %s918_s9 = sadd.s32 4294967295, %s1185_s8   ;;  %s919_s10 = sadd.s32 4294967294, %s1185_s8   ;;  %s1185_s8 = sphi %s1249_s8, %s21_s8   ;;  %s1181_s30 = sphi %s1247_s30, %s1430_s30   ;;  %s1177_s29 = sphi %s1245_s29, %s1429_s29   ;;  %s1173_s28 = sphi %s1243_s28, %s1428_s28   ;;  %s1169_s27 = sphi %s1241_s27, %s1427_s27   ;;  %s1165_s26 = sphi %s1239_s26, %s1426_s26   ;;  %s1161_s25 = sphi %s1237_s25, %s1425_s25   ;;  %s1157_s24 = sphi %s1235_s24, %s1424_s24  }
   0x9   : > { %s36_s11 = sadd.s32 1, %s1177_s29  ;;  %s40_s12 = sadd.s32 1, %s1181_s30 }
   0xa   : > { %p38_p0 = scmp.ge.s32.totalorder %s36_s11, 2  ;;  %s220_s13 = sadd.s32 1, %s1165_s26 }
   0xb   : > { %p230_p1 = scmp.ne.s32.totalorder %s1165_s26, %s1161_s25  ;;  %p231_p2 = scmp.eq.s32.totalorder %s918_s9, 3 }
   0xc   : > { %s1432_s11 = smov (%p38_p0, %s36_s11), 0  ;;  %s1434_s12 = smov (!%p38_p0, %s40_s12), %s1181_s30 }
   0xd   : > { %p1285_p3 = por %p231_p2, %p230_p1  ;;  %p236_p4 = scmp.ne.s32.totalorder %s1161_s25, %s1157_s24 }
   0xe   : > { %p42_p5 = scmp.ge.s32.totalorder %s1434_s12, 2  ;;  %p237_p6 = scmp.eq.s32.totalorder %s919_s10, 3 }
   0xf   : > { %p920_p7 = scmp.ge.s32.totalorder %s1185_s8, 1  ;;  %p244_p8 = scmp.lt.s32.totalorder %s1185_s8, 5 }
  0x10   : > { %s1436_s12 = smov (%p42_p5, %s1434_s12), 0  ;;  %p1295_p9 = por %p237_p6, %p236_p4 }
  0x11   : > { %p1299_p10 = pnand %p920_p7, %p244_p8  ;;  %s215_s17 = ssub.s32 %s1181_s30, %s1436_s12 }
  0x12   : > { %s1419_s15 = scalar_select %p1295_p9, 1, 0 }
  0x13   : > { %p218_p11 = scmp.eq.s32.totalorder %s215_s17, 0  ;;  %p973_p12 = pneg %p1299_p10 }
  0x14   : > { %p1307_p13 = scmp.eq.s32.totalorder %s918_s9, 0  ;;  %s1187_s20 = smov [#allocation5]  }
  0x15   : > { %s1312_s19 = scalar_select %p218_p11, %s1165_s26, %s220_s13  }
  0x16   : > { %s269_s21 = sshll.u32 %s1187_s20, 4  ;;  %p974_p0 = pnand %p1307_p13, %p973_p12  ;;  %s270_s21 = int_to_ptr.vmem [resolvable:$true] %s269_s21 }
  0x17   : > { %s1074_s22 = scalar_lea.vmem %s270_s21, 128  ;;  %p1082_p6 = scmp.lt.s32.totalorder %s270_s21, %s270_s21 }
  0x18   : > { %p1065_p1 = pneg %p974_p0  ;;  %p1075_p2 = scmp.ne.s32.totalorder %s270_s21, %s1074_s22 }
  0x19   : > { %p1083_p7 = scmp.lt.s32.totalorder %s1074_s22, %s1074_s22 }
  0x1a   : > { %p1077_p4 = pnand %p1075_p2, %p1065_p1 }
  0x1b   : > { %p1084_p8 = por %p1083_p7, %p1082_p6 }
  0x1c   : > { %p1078_p5 = pneg %p1077_p4 }
  0x1e   : > { %p1085_p9 = pnand %p1084_p8, %p1078_p5 }
  0x20   : > { %1088 = shalt.err (!%p1085_p9)
}
  0x21   : > { %s1422_s6 = sld [smem:[#allocation11_spill]] }
  0x23   : > { %316 = sbr.rel (%p1299_p10) target bundleno = 999 (0x3e7), region = 48 }
  0x27   : > { %976 = dma.hbm_to_vmem [thread:$0]  (!%p974_p0), %s1422_s6, 128, %s270_s21, [#allocation6]  }
  0x28   : > { %1148 = dma.done.wait (%p1307_p13), [#allocation6], 128  }
  0x29   : > { %1150 = vsyncadd (%p1307_p13), [#allocation6], 4294967168  ;;  %s362_s10 = sand.u32 1, %s1161_s25   ;;  %p368_p9 = scmp.lt.s32.totalorder %s1173_s28, 1 }
  0x2a   : > { %s925_s13 = sshll.u32 %s362_s10, 4  ;;  %p395_p11 = scmp.eq.s32.totalorder %s1169_s27, 0 }
  0x2b   : > { %s369_s17 = scalar_select %p368_p9, %s1173_s28, 1  ;;  %vm401_vm0 = vcmask (%p395_p11), 7168   ;;  %v1188_v0 = vmov (%p395_p11), 0.0  }
  0x2c   : > { %s1337_s6 = scalar_lea.vmem [#allocation8], %s925_s13  ;;  %400 = sbr.rel (!%p395_p11) target bundleno = 49 (0x31), region = 56  ;;  %402 = vst.msk [vmem:[#allocation2] sm:$0xff] (%p395_p11), %vm401_vm0, %v1188_v0 }
  0x2d   : > { %s948_s20 = sshll.u32 %s369_s17, 3 }
  0x2e   : > { %s375_s22 = scalar_lea.vmem %s1409_s0, %s948_s20  ;;  %s389_s18 = scalar_lea.vmem %s1410_s1, %s948_s20 }
  0x31 PF: > { %p931_p10 = scmp.ne.s32.totalorder %s1169_s27, 0 }
  0x33   : > { %405 = sbr.rel (%p931_p10) target bundleno = 406 (0x196), region = 60 }
  0x38   : > { %v409_v1 = vld [vmem:[%s389_s18] sm:$0xff]  ;;  %vm416_vm1 = vcmask 1043456   ;;  %v1189_v5 = vmov 0.0   ;;  %vm412_vm2 = vcmask 31744   ;;  %v1190_v8 = vmov 0  }
  0x39   : > { %v407_v2 = vld [vmem:[%s375_s22] sm:$0xff]  ;;  %v411_v3 = vcombine.high %v409_v1, %v409_v1  ;;  %485 = vmatprep.mubr.f32.mxu0 %v1189_v5  ;;  %565 = vmatprep.mubr.f32.mxu1 %v1189_v5  ;;  %vm587_vm3 = vcmask 7168  }
  0x3a   : > { %v493_v4 = vcombine.high %v407_v2, %v407_v2  ;;  %v408_v6 = vld [vmem:[%s1412_s3] sm:$0xff]  ;;  %1055 = vset.pattern.permute.xlu0 %v1190_v8 }
  0x3b   : > { %v406_v7 = vld [vmem:[%s1411_s2] sm:$0xff]  ;;  %932 = vmatprep.subr.msk.mxu0 %vm416_vm1, %v411_v3 }
  0x3c   : > { %935 = vmatprep.subr.msk.mxu1 %vm416_vm1, %v493_v4  ;;  %v572_v9 = vld [vmem:[%s1413_s4] sm:$0xff]  ;;  %933 = vmatpush1.msk.msra.mxu0 %vm416_vm1, %v409_v1 }
  0x3d   : > { %936 = vmatpush1.msk.msra.mxu1 %vm416_vm1, %v407_v2  ;;  %934 = vmatmul.mubr.msk.f32.vlgmr.msra.gmra.mxu0 %vm412_vm2, %v408_v6  ;;  %v582_v22 = vld [vmem:[#allocation2] sm:$0xff] }
  0x3e   : > { %937 = vmatmul.mubr.msk.f32.vlgmr.msra.gmra.mxu1 %vm412_vm2, %v406_v7  ;;  %575 = vperm.xlu0 %1055, %v572_v9  }
  0xb9   : > { %v576_v10 = vpop.permute.xlu0 %575 }
  0xfd   : > { %v487_v11 = vpop.f32.mrf.mxu0 }
  0xfe   : > { %v567_v12 = vpop.f32.mrf.mxu1 }
  0xff   : > { %v568_v13 = vadd.f32 %v567_v12, %v487_v11  ;;  %v489_v14 = vpop.f32.mrf.mxu0 }
 0x100   : > { %v569_v15 = vpop.f32.mrf.mxu1 }
 0x101   : > { %v578_v16 = vadd.f32 %v576_v10, %v568_v13  ;;  %v570_v17 = vadd.f32 %v569_v15, %v489_v14 }
 0x103   : > { %v580_v18 = vmax.f32 %v578_v16, 0.0  ;;  %v579_v19 = vadd.f32 %v576_v10, %v570_v17 }
 0x105   : > { %594 = vst [vmem:[#allocation4] sm:$0xff] %v580_v18  ;;  %596 = vst [vmem:[%s1337_s6] sm:$0xff] %v580_v18  ;;  %v581_v20 = vmax.f32 %v579_v19, 0.0 }
 0x107   : > { %595 = vst [vmem:[#allocation4 + $0x8] sm:$0xff] %v581_v20  ;;  %597 = vst [vmem:[%s1337_s6 + $0x8] sm:$0xff] %v581_v20  ;;  %v583_v21 = vadd.f32 %v581_v20, %v580_v18 }
 0x109   : > { %584 = vadd.xlane.f32.xlu0 %v583_v21 }
 0x192   : > { %v585_v23 = vpop.xlane.xlu0 %584 }
 0x193   : > { %v586_v24 = vadd.f32 %v585_v23, %v582_v22 }
 0x195   : > { %588 = vst.msk [vmem:[#allocation2] sm:$0xff] %vm587_vm3, %v586_v24 }
 0x196 PF: > { %p598_p12 = scmp.eq.s32.totalorder %s1169_s27, 1 }
 0x197   : > { %v1191_v26 = vmov (%p598_p12), 0.0   ;;  %vm1192_vm4 = vmmov (%p598_p12), 0   ;;  %v605_v28 = vld [vmem:[%s1414_s5] sm:$0xff] (%p598_p12)  ;;  %vm606_vm5 = vcmask (%p598_p12), 64512   ;;  %vm762_vm6 = vcmask (%p598_p12), 7168  }
 0x198   : > { %602 = sbr.rel (!%p598_p12) target bundleno = 840 (0x348), region = 64  ;;  %957 = vmatprep.subr.mxu0 (%p598_p12), %v1191_v26  ;;  %959 = vmatprep.mubr.msk.f32.mxu0 (%p598_p12), %vm1192_vm4, %v1191_v26  ;;  %v681_v31 = vld [vmem:[#allocation5] sm:$0xff] (%p598_p12) }
 0x199   : > { %962 = vmatprep.subr.mxu1 (%p598_p12), %v1191_v26  ;;  %964 = vmatprep.mubr.msk.f32.mxu1 (%p598_p12), %vm1192_vm4, %v1191_v26 }
 0x19c   : > { %v603_v25 = vld [vmem:[#allocation2] sm:$0xff] (%p598_p12) }
 0x19d   : > { %v604_v27 = vmul.f32 0.00390625, %v603_v25 }
 0x19f   : > { %958 = vmatpush3.msra.mxu0 %v604_v27 }
 0x1a0   : > { %960 = vmatmul.mubr.msk.f32.vlgmr.msra.gmra.mxu0 %vm606_vm5, %v605_v28 }
 0x260   : > { %v676_v29 = vpop.f32.mrf.mxu0 }
 0x261   : > { %v680_v30 = vmax.f32 %v676_v29, 0.0 }
 0x262   : > { %v961_v32 = vpop.f32.mrf.mxu0 }
 0x263   : > { %963 = vmatpush3.msra.mxu1 %v680_v30 }
 0x264   : > { %965 = vmatmul.mubr.msk.f32.vlgmr.msra.gmra.mxu1 %vm606_vm5, %v681_v31 }
 0x324   : > { %v751_v33 = vpop.f32.mrf.mxu1 }
 0x325   : > { %v941_v34 = vmul.f32 -1.442695, %v751_v33 }
 0x326   : > { %v966_v35 = vpop.f32.mrf.mxu1 }
 0x327   : > { %1058 = vpow2.f32 %v941_v34 }
 0x334   : > { %v1059_v36 = vpop.eup %1058 }
 0x335   : > { %v758_v37 = vadd.f32 1.0, %v1059_v36 }
 0x337   : > { %1060 = vrcp.f32 %v758_v37 }
 0x344   : > { %v1061_v38 = vpop.eup %1060 }
 0x345   : > { %v761_v39 = vadd.f32 1.0, %v1061_v38 }
 0x347   : > { %763 = vst.msk [vmem:[#allocation3] sm:$0xff] %vm762_vm6, %v761_v39 }
 0x348 PF: > { %p942_p13 = scmp.ne.s32.totalorder %s1169_s27, 1 }
 0x34a   : > { %766 = sbr.rel (%p942_p13) target bundleno = 976 (0x3d0), region = 68 }
 0x34f   : > { %v774_v40 = vld [vmem:[#allocation3] sm:$0xff]  ;;  %v1193_v41 = vmov 0   ;;  %v772_v42 = vld [vmem:[#allocation4] sm:$0xff]  ;;  %v773_v43 = vld [vmem:[#allocation4 + $0x8] sm:$0xff] }
 0x350   : > { %1062 = vset.pattern.permute.xlu0 %v1193_v41 }
 0x351   : > { %777 = vperm.xlu0 %1062, %v774_v40  }
 0x3cc   : > { %v778_v44 = vpop.permute.xlu0 %777 }
 0x3cd   : > { %v780_v45 = vmul.f32 %v778_v44, %v772_v42  ;;  %v781_v46 = vmul.f32 %v778_v44, %v773_v43 }
 0x3cf   : > { %782 = vst [vmem:[%s1337_s6] sm:$0xff] %v780_v45  ;;  %783 = vst [vmem:[%s1337_s6 + $0x8] sm:$0xff] %v781_v46 }
 0x3d0 PF: > { %s952_s27 = sshll.u32 %s1173_s28, 8  ;;  %s802_s13 = sshll.u32 %s1337_s6, 4  ;;  %s803_s13 = int_to_ptr.vmem [resolvable:$true] %s802_s13 }
 0x3d1   : > { %s800_s20 = scalar_lea.hbm %s1416_s7, %s952_s27  ;;  %s785_s16 = scalar_lea.sflag [#allocation7], %s362_s10 }
 0x3d2   : > { %s1089_s21 = scalar_lea.vmem %s803_s13, 256  ;;  %s1194_s22 = smov [#allocation8]  }
 0x3d3   : > { %p1090_p0 = scmp.ne.s32.totalorder %s803_s13, %s1089_s21  ;;  %s1093_s23 = sshll.u32 %s1194_s22, 4  ;;  %s1094_s23 = int_to_ptr.vmem [resolvable:$false] %s1093_s23 }
 0x3d4   : > { %s1095_s9 = scalar_lea.vmem %s1094_s23, 512  ;;  %p1096_p4 = scmp.lt.s32.totalorder %s803_s13, %s1094_s23 }
 0x3d5   : > { %p1091_p1 = pnand %p1090_p0, %p1285_p3  ;;  %p1097_p5 = scmp.lt.s32.totalorder %s1095_s9, %s1089_s21 }
 0x3d7   : > { %p1092_p2 = pneg %p1091_p1  ;;  %p1098_p6 = por %p1097_p5, %p1096_p4 }
 0x3d9   : > { %p1099_p7 = pnand %p1098_p6, %p1092_p2 }
 0x3db   : > { %1102 = shalt.err (!%p1099_p7)
}
 0x3dc   : > { %s1103_s28 = scalar_lea.hbm %s800_s20, 256  ;;  %s1107_s27 = scalar_lea.hbm %s1416_s7, 512 }
 0x3dd   : > { %p1104_p8 = scmp.ne.s32.totalorder %s800_s20, %s1103_s28  ;;  %p1108_p10 = scmp.lt.s32.totalorder %s800_s20, %s1416_s7 }
 0x3de   : > { %p1109_p12 = scmp.lt.s32.totalorder %s1107_s27, %s1103_s28 }
 0x3df   : > { %p1105_p9 = pnand %p1104_p8, %p1285_p3 }
 0x3e0   : > { %p1110_p13 = por %p1109_p12, %p1108_p10 }
 0x3e1   : > { %p1106_p11 = pneg %p1105_p9 }
 0x3e3   : > { %p1111_p0 = pnand %p1110_p13, %p1106_p11 }
 0x3e5   : > { %1114 = shalt.err (!%p1111_p0)
}
 0x3e6   : > { %971 = dma.vmem_to_hbm [thread:$0]  (%p1285_p3), %s803_s13, 256, %s800_s20, %s785_s16  }
 0x3e7 PF: > { %p983_p1 = scmp.ge.s32.totalorder %s1185_s8, 2  ;;  %s814_s21 = sand.u32 1, %s1157_s24  }
 0x3e8   : > { %p1423_p2 = scmp.ne.s32.totalorder %s1419_s15, 0  ;;  %s815_s22 = scalar_lea.sflag [#allocation7], %s814_s21 }
 0x3ea   : > { %p978_p4 = pnand %p983_p1, %p1423_p2 }
 0x3ec   : > { %p979_p5 = pneg %p978_p4 }
 0x3ee   : > { %1152 = dma.done.wait (%p979_p5), %s815_s22, 256  }
 0x3ef   : > { %1154 = vsyncadd (%p979_p5), %s815_s22, 4294967040  ;;  %s21_s8 = sadd.s32 1, %s1185_s8   ;;  %s1424_s24 = smov %s1161_s25 }
 0x3f0   : > { %p18_p6 = scmp.ge.s32.totalorder %s21_s8, 6   ;;  %s1425_s25 = smov %s1165_s26 }
 0x3f1   : > { %s1426_s26 = smov %s1312_s19  ;;  %s1427_s27 = smov %s1177_s29 }
 0x3f2   : > { %s1428_s28 = smov %s1181_s30  ;;  %s1429_s29 = smov %s1432_s11 }
 0x3f3   : > { %s1430_s30 = smov %s1436_s12  ;;  %20 = sbr.rel (!%p18_p6) target bundleno = 8 (0x8), region = 109 }
 0x3f8   :  { %820 = vsyncpa [#allocation6], 1 }
 0x3f9   :  { %822 = vsyncpa [#allocation6 + $0x1], 1 }
 0x3fa   :  { %823 = vsyncpa [#allocation7], 1 }
 0x3fb   :  { %825 = vsyncpa [#allocation7 + $0x1], 1 }

</bundles_post_ra>
